<compile_context>
chip_gen: v6e
topology: v6e:2x2x1
jax: 0.10.0
libtpu: 0.0.40
codegen_flags: <defaults>
</compile_context>

<pallas_src>
import functools

import jax
import jax.numpy as jnp
from jax.experimental import pallas as pl
from jax.experimental.pallas import tpu as pltpu

# Deterministic, synthetic "parameters" (would be __init__ args in PyTorch).
R_EQUILIBRIUM = 1.0
WELL_DEPTH = 0.2
CUTOFF = 2.5
HEALING_LENGTH = 0.5

LANES = 128             # pairs per row (lane axis)
MAX_BLOCK_ROWS = 2048   # rows per grid step (sublane-major axis); ~7 MiB/step


def _lj_pair_kernel(vec_ref, yij_ref, g_ref, *, r_eq, well_depth, cutoff, healing):
    """Per-pair elementwise hot path.

    vec_ref : (3, BR, 128) f32   vec_ij components (padding is beyond cutoff)
    yij_ref : (BR, 128)    f32   0.5 * well_depth * (p12 - p6) * switch
    g_ref   : (3, BR, 128) f32   dE_pair / dvec_ij
    """
    # Per-plane loads (avoid keeping the full (3, BR, 128) value live).
    vx = vec_ref[0]                                           # (BR, 128)
    vy = vec_ref[1]
    vz = vec_ref[2]

    r2 = vx * vx + vy * vy + vz * vz                          # (BR, 128)
    # NOTE: like the PyTorch reference, r == 0 for a coincident *real* pair
    # would produce inf/NaN; padding lanes have r > cutoff and are safe.
    inv_r = jax.lax.rsqrt(r2)
    r = r2 * inv_r

    # --- CustomCutoff (switch) and its derivative -------------------------
    inv_h = 1.0 / healing
    s = (r - (cutoff - healing)) * inv_h
    r_function = 1.0 + s * s * (2.0 * s - 3.0)
    ones = jnp.ones_like(r)
    zeros = jnp.zeros_like(r)
    switch = jnp.where(r > cutoff - healing, r_function, ones)
    switch = jnp.where(r > cutoff, zeros, switch)
    dswitch = jnp.where((r > cutoff - healing) & (r <= cutoff),
                        (6.0 * inv_h) * s * (s - 1.0), zeros)

    # --- Lennard-Jones powers ---------------------------------------------
    p2 = (r_eq * r_eq) * (inv_r * inv_r)
    p6 = p2 * p2 * p2
    p12 = p6 * p6

    f = (p12 - p6) * switch
    dfdr = (6.0 * p6 - 12.0 * p12) * inv_r * switch + (p12 - p6) * dswitch

    half_d = 0.5 * well_depth
    yij_ref[...] = half_d * f                                 # padding -> 0
    coeff = (half_d * inv_r) * dfdr                           # (BR, 128)
    # Per-plane stores so Mosaic can retire each g plane early.
    g_ref[0] = coeff * vx
    g_ref[1] = coeff * vy
    g_ref[2] = coeff * vz


def lj_pairwise(vec_planes, block_rows):
    """vec_planes: (3, rows_p, 128) f32, rows_p a multiple of block_rows."""
    _, rows_p, lanes = vec_planes.shape
    kernel = functools.partial(
        _lj_pair_kernel,
        r_eq=R_EQUILIBRIUM, well_depth=WELL_DEPTH,
        cutoff=CUTOFF, healing=HEALING_LENGTH)
    return pl.pallas_call(
        kernel,
        out_shape=(jax.ShapeDtypeStruct((rows_p, lanes), jnp.float32),
                   jax.ShapeDtypeStruct((3, rows_p, lanes), jnp.float32)),
        grid=(rows_p // block_rows,),
        in_specs=[pl.BlockSpec((3, block_rows, lanes), lambda i: (0, i, 0))],
        out_specs=(pl.BlockSpec((block_rows, lanes), lambda i: (i, 0)),
                   pl.BlockSpec((3, block_rows, lanes), lambda i: (0, i, 0))),
        compiler_params=pltpu.CompilerParams(
            dimension_semantics=("parallel",),
            vmem_limit_bytes=32 * 1024 * 1024),
    )(vec_planes)


def _choose_block_rows(n_pairs):
    """Pick (block_rows, rows_p): big blocks, >=2 grid steps when possible."""
    rows = -(-n_pairs // LANES)
    rows8 = ((rows + 7) // 8) * 8                   # sublane multiple
    block_rows = min(MAX_BLOCK_ROWS, rows8)
    if rows8 >= 16:
        # Cap at ~half the rows (rounded up to a multiple of 8) so the grid
        # has >=2 "parallel" steps -> both v7x TensorCores get work.
        half = ((-(-rows8 // 2)) + 7) // 8 * 8
        block_rows = min(block_rows, half)
    rows_p = -(-rows8 // block_rows) * block_rows
    return block_rows, rows_p


def lj_model_forward(positions, cell, idx_i, idx_j, offsets, idx_m, n_mols):
    """JAX re-implementation of LJModel.forward.

    positions: (n_atoms, 3) f32, cell: (n_mols, 3, 3) f32,
    idx_i/idx_j: (n_pairs,) i32, offsets: (n_pairs, 3) f32,
    idx_m: (n_atoms,) i32 molecule index per atom.
    Returns {"energy": (n_mols,), "forces": (n_atoms, 3), "stress": (n_mols, 3, 3)}.
    """
    n_atoms = positions.shape[0]
    n_pairs = idx_i.shape[0]
    positions = positions.astype(jnp.float32)
    offsets = offsets.astype(jnp.float32)

    # Per-component pair vectors (kept flat; no (n_pairs, 3) transpose needed).
    vec_c = [positions[idx_j, c] + offsets[:, c] - positions[idx_i, c]
             for c in range(3)]                               # 3 x (n_pairs,)

    # (rows, 128) layout for the pair axis; pad with a beyond-cutoff value so
    # the switch zeroes padded lanes (no mask needed).
    block_rows, rows_p = _choose_block_rows(n_pairs)
    P = rows_p * LANES
    pad = P - n_pairs

    # Single producing fusion per component: gather + offset-add + pad, then
    # stack directly into the final (3, rows_p, 128) layout.
    vec_planes = jnp.stack(
        [jnp.pad(v, (0, pad), constant_values=CUTOFF + 1.0) for v in vec_c],
        axis=0).reshape(3, rows_p, LANES)

    yij_planes, g_planes = lj_pairwise(vec_planes, block_rows)

    # Contiguous flattening back to the pair axis (row-major; no transposes).
    yij = yij_planes.reshape(P)[:n_pairs]                     # (n_pairs,)
    g_c = [g_planes[c].reshape(P)[:n_pairs] for c in range(3)]  # 3 x (n_pairs,)

    seg_pair = idx_m[idx_i]                                   # molecule per pair

    # Energy per molecule (matches scatter_add over atoms + index_add over mols).
    energy = jax.ops.segment_sum(yij, seg_pair, num_segments=n_mols)

    # Forces: F = -dE/dR ; dvec/dR_j = +I, dvec/dR_i = -I
    forces = jnp.stack(
        [jax.ops.segment_sum(g_c[c], idx_i, num_segments=n_atoms)
         - jax.ops.segment_sum(g_c[c], idx_j, num_segments=n_atoms)
         for c in range(3)], axis=-1)                         # (n_atoms, 3)

    # Stress: (1/V) * dE/dstrain, per molecule.
    # dE/dstrain_{ab} = sum_pairs vec_a * g_b. Since g = coeff * vec, this is
    # symmetric: compute only the 6 upper-triangle reductions and mirror.
    v00 = jax.ops.segment_sum(vec_c[0] * g_c[0], seg_pair, num_segments=n_mols)
    v01 = jax.ops.segment_sum(vec_c[0] * g_c[1], seg_pair, num_segments=n_mols)
    v02 = jax.ops.segment_sum(vec_c[0] * g_c[2], seg_pair, num_segments=n_mols)
    v11 = jax.ops.segment_sum(vec_c[1] * g_c[1], seg_pair, num_segments=n_mols)
    v12 = jax.ops.segment_sum(vec_c[1] * g_c[2], seg_pair, num_segments=n_mols)
    v22 = jax.ops.segment_sum(vec_c[2] * g_c[2], seg_pair, num_segments=n_mols)
    dEdstrain = jnp.stack(
        [v00, v01, v02,
         v01, v11, v12,
         v02, v12, v22], axis=-1).reshape(n_mols, 3, 3)
    volume = jnp.abs(jnp.linalg.det(cell))[:, None, None]
    stress = dEdstrain / volume

    return {"energy": energy, "forces": forces, "stress": stress}


if __name__ == "__main__":
    key = jax.random.PRNGKey(0)
    n_mols = 2
    atoms_per_mol = 8
    n_atoms = n_mols * atoms_per_mol
    box = 4.0

    # Deterministic atom positions: jittered 2x2x2 grid per molecule.
    grid_pts = jnp.array([[x, y, z] for x in (0.0, 1.2)
                          for y in (0.0, 1.2) for z in (0.0, 1.2)],
                         dtype=jnp.float32) + 0.8
    k1, k2 = jax.random.split(key)
    jitter = jax.random.uniform(k1, (n_mols, atoms_per_mol, 3),
                                minval=-0.1, maxval=0.1, dtype=jnp.float32)
    positions = (grid_pts[None, :, :] + jitter).reshape(n_atoms, 3)

    # Per-molecule cubic cell.
    cell = jnp.tile(jnp.eye(3, dtype=jnp.float32)[None] * box, (n_mols, 1, 1))

    # Molecule index per atom.
    idx_m = jnp.repeat(jnp.arange(n_mols, dtype=jnp.int32), atoms_per_mol)

    # Full intra-molecular neighbor list (i != j), both directions.
    ii, jj = [], []
    for m in range(n_mols):
        base = m * atoms_per_mol
        for a in range(atoms_per_mol):
            for b in range(atoms_per_mol):
                if a != b:
                    ii.append(base + a)
                    jj.append(base + b)
    idx_i = jnp.array(ii, dtype=jnp.int32)
    idx_j = jnp.array(jj, dtype=jnp.int32)
    offsets = jnp.zeros((idx_i.shape[0], 3), dtype=jnp.float32)
    # TODO(synk): periodic-image offsets from a real neighbor list are passed as
    # zeros here; the kernel handles nonzero offsets identically.

    out = lj_model_forward(positions, cell, idx_i, idx_j, offsets, idx_m, n_mols)
    out = jax.block_until_ready(out)

    assert out["energy"].shape == (n_mols,)
    assert out["forces"].shape == (n_atoms, 3)
    assert out["stress"].shape == (n_mols, 3, 3)
    assert bool(jnp.all(jnp.isfinite(out["energy"])))
    assert bool(jnp.all(jnp.isfinite(out["forces"])))
    assert bool(jnp.all(jnp.isfinite(out["stress"])))

    print("KERNEL_OK")
</pallas_src>

<mosaic_0001>
module attributes {stable_mosaic.version = 11 : i64} {
  func.func @_lj_pair_kernel(%arg0: i32, %arg1: memref<3x8x128xf32, #tpu.memory_space<vmem>>, %arg2: memref<8x128xf32, #tpu.memory_space<vmem>>, %arg3: memref<3x8x128xf32, #tpu.memory_space<vmem>>) attributes {dimension_semantics = [#tpu.dimension_semantics<parallel>], iteration_bounds = array<i64: 1>, scalar_prefetch = 0 : i64, scratch_operands = 0 : i64, tpu.core_type = #tpu.core_type<tc>, window_params = [{transform_indices = @transform_0, window_bounds = array<i64: 3, 8, 128>}, {transform_indices = @transform_1, window_bounds = array<i64: 8, 128>}, {transform_indices = @transform_2, window_bounds = array<i64: 3, 8, 128>}]} {
    %c0 = arith.constant 0 : index
    %c0_0 = arith.constant 0 : index
    %c0_1 = arith.constant 0 : index
    %0 = vector.load %arg1[%c0, %c0_0, %c0_1] : memref<3x8x128xf32, #tpu.memory_space<vmem>>, vector<1x8x128xf32>
    %1 = vector.shape_cast %0 : vector<1x8x128xf32> to vector<8x128xf32>
    %c1 = arith.constant 1 : index
    %c0_2 = arith.constant 0 : index
    %c0_3 = arith.constant 0 : index
    %2 = vector.load %arg1[%c1, %c0_2, %c0_3] : memref<3x8x128xf32, #tpu.memory_space<vmem>>, vector<1x8x128xf32>
    %3 = vector.shape_cast %2 : vector<1x8x128xf32> to vector<8x128xf32>
    %c2 = arith.constant 2 : index
    %c0_4 = arith.constant 0 : index
    %c0_5 = arith.constant 0 : index
    %4 = vector.load %arg1[%c2, %c0_4, %c0_5] : memref<3x8x128xf32, #tpu.memory_space<vmem>>, vector<1x8x128xf32>
    %5 = vector.shape_cast %4 : vector<1x8x128xf32> to vector<8x128xf32>
    %6 = arith.mulf %1, %1 : vector<8x128xf32>
    %7 = arith.mulf %3, %3 : vector<8x128xf32>
    %8 = arith.addf %6, %7 : vector<8x128xf32>
    %9 = arith.mulf %5, %5 : vector<8x128xf32>
    %10 = arith.addf %8, %9 : vector<8x128xf32>
    %11 = math.rsqrt %10 : vector<8x128xf32>
    %12 = arith.mulf %10, %11 : vector<8x128xf32>
    %cst = arith.constant 2.000000e+00 : f32
    %13 = vector.broadcast %cst : f32 to vector<8x128xf32>
    %14 = arith.subf %12, %13 : vector<8x128xf32>
    %cst_6 = arith.constant 2.000000e+00 : f32
    %15 = vector.broadcast %cst_6 : f32 to vector<8x128xf32>
    %16 = arith.mulf %14, %15 : vector<8x128xf32>
    %17 = arith.mulf %16, %16 : vector<8x128xf32>
    %cst_7 = arith.constant 2.000000e+00 : f32
    %18 = vector.broadcast %cst_7 : f32 to vector<8x128xf32>
    %19 = arith.mulf %18, %16 : vector<8x128xf32>
    %cst_8 = arith.constant 3.000000e+00 : f32
    %20 = vector.broadcast %cst_8 : f32 to vector<8x128xf32>
    %21 = arith.subf %19, %20 : vector<8x128xf32>
    %22 = arith.mulf %17, %21 : vector<8x128xf32>
    %cst_9 = arith.constant 1.000000e+00 : f32
    %23 = vector.broadcast %cst_9 : f32 to vector<8x128xf32>
    %24 = arith.addf %23, %22 : vector<8x128xf32>
    %cst_10 = arith.constant 1.000000e+00 : f32
    %25 = vector.broadcast %cst_10 : f32 to vector<8x128xf32>
    %cst_11 = arith.constant 0.000000e+00 : f32
    %26 = vector.broadcast %cst_11 : f32 to vector<8x128xf32>
    %cst_12 = arith.constant 2.000000e+00 : f32
    %27 = vector.broadcast %cst_12 : f32 to vector<8x128xf32>
    %28 = arith.cmpf ogt, %12, %27 : vector<8x128xf32>
    %29 = arith.select %28, %24, %25 : vector<8x128xi1>, vector<8x128xf32>
    %cst_13 = arith.constant 2.500000e+00 : f32
    %30 = vector.broadcast %cst_13 : f32 to vector<8x128xf32>
    %31 = arith.cmpf ogt, %12, %30 : vector<8x128xf32>
    %32 = arith.select %31, %26, %29 : vector<8x128xi1>, vector<8x128xf32>
    %cst_14 = arith.constant 2.000000e+00 : f32
    %33 = vector.broadcast %cst_14 : f32 to vector<8x128xf32>
    %34 = arith.cmpf ogt, %12, %33 : vector<8x128xf32>
    %cst_15 = arith.constant 2.500000e+00 : f32
    %35 = vector.broadcast %cst_15 : f32 to vector<8x128xf32>
    %36 = arith.cmpf ole, %12, %35 : vector<8x128xf32>
    %37 = arith.andi %34, %36 : vector<8x128xi1>
    %cst_16 = arith.constant 1.200000e+01 : f32
    %38 = vector.broadcast %cst_16 : f32 to vector<8x128xf32>
    %39 = arith.mulf %38, %16 : vector<8x128xf32>
    %cst_17 = arith.constant 1.000000e+00 : f32
    %40 = vector.broadcast %cst_17 : f32 to vector<8x128xf32>
    %41 = arith.subf %16, %40 : vector<8x128xf32>
    %42 = arith.mulf %39, %41 : vector<8x128xf32>
    %43 = arith.select %37, %42, %26 : vector<8x128xi1>, vector<8x128xf32>
    %44 = arith.mulf %11, %11 : vector<8x128xf32>
    %cst_18 = arith.constant 1.000000e+00 : f32
    %45 = vector.broadcast %cst_18 : f32 to vector<8x128xf32>
    %46 = arith.mulf %45, %44 : vector<8x128xf32>
    %47 = arith.mulf %46, %46 : vector<8x128xf32>
    %48 = arith.mulf %47, %46 : vector<8x128xf32>
    %49 = arith.mulf %48, %48 : vector<8x128xf32>
    %50 = arith.subf %49, %48 : vector<8x128xf32>
    %51 = arith.mulf %50, %32 : vector<8x128xf32>
    %cst_19 = arith.constant 6.000000e+00 : f32
    %52 = vector.broadcast %cst_19 : f32 to vector<8x128xf32>
    %53 = arith.mulf %52, %48 : vector<8x128xf32>
    %cst_20 = arith.constant 1.200000e+01 : f32
    %54 = vector.broadcast %cst_20 : f32 to vector<8x128xf32>
    %55 = arith.mulf %54, %49 : vector<8x128xf32>
    %56 = arith.subf %53, %55 : vector<8x128xf32>
    %57 = arith.mulf %56, %11 : vector<8x128xf32>
    %58 = arith.mulf %57, %32 : vector<8x128xf32>
    %59 = arith.subf %49, %48 : vector<8x128xf32>
    %60 = arith.mulf %59, %43 : vector<8x128xf32>
    %61 = arith.addf %58, %60 : vector<8x128xf32>
    %cst_21 = arith.constant 1.000000e-01 : f32
    %62 = vector.broadcast %cst_21 : f32 to vector<8x128xf32>
    %63 = arith.mulf %62, %51 : vector<8x128xf32>
    %c0_22 = arith.constant 0 : index
    %c0_23 = arith.constant 0 : index
    %64 = vector.load %arg2[%c0_22, %c0_23] : memref<8x128xf32, #tpu.memory_space<vmem>>, vector<8x128xf32>
    tpu.vector_store %arg2[%c0_22, %c0_23], %63 {strides = array<i32>} : memref<8x128xf32, #tpu.memory_space<vmem>>, vector<8x128xf32>,
    %cst_24 = arith.constant 1.000000e-01 : f32
    %65 = vector.broadcast %cst_24 : f32 to vector<8x128xf32>
    %66 = arith.mulf %65, %11 : vector<8x128xf32>
    %67 = arith.mulf %66, %61 : vector<8x128xf32>
    %68 = arith.mulf %67, %1 : vector<8x128xf32>
    %c0_25 = arith.constant 0 : index
    %c0_26 = arith.constant 0 : index
    %c0_27 = arith.constant 0 : index
    %69 = vector.load %arg3[%c0_25, %c0_26, %c0_27] : memref<3x8x128xf32, #tpu.memory_space<vmem>>, vector<1x8x128xf32>
    %70 = vector.shape_cast %69 : vector<1x8x128xf32> to vector<8x128xf32>
    %71 = vector.shape_cast %68 : vector<8x128xf32> to vector<1x8x128xf32>
    tpu.vector_store %arg3[%c0_25, %c0_26, %c0_27], %71 {strides = array<i32>} : memref<3x8x128xf32, #tpu.memory_space<vmem>>, vector<1x8x128xf32>,
    %72 = arith.mulf %67, %3 : vector<8x128xf32>
    %c1_28 = arith.constant 1 : index
    %c0_29 = arith.constant 0 : index
    %c0_30 = arith.constant 0 : index
    %73 = vector.load %arg3[%c1_28, %c0_29, %c0_30] : memref<3x8x128xf32, #tpu.memory_space<vmem>>, vector<1x8x128xf32>
    %74 = vector.shape_cast %73 : vector<1x8x128xf32> to vector<8x128xf32>
    %75 = vector.shape_cast %72 : vector<8x128xf32> to vector<1x8x128xf32>
    tpu.vector_store %arg3[%c1_28, %c0_29, %c0_30], %75 {strides = array<i32>} : memref<3x8x128xf32, #tpu.memory_space<vmem>>, vector<1x8x128xf32>,
    %76 = arith.mulf %67, %5 : vector<8x128xf32>
    %c2_31 = arith.constant 2 : index
    %c0_32 = arith.constant 0 : index
    %c0_33 = arith.constant 0 : index
    %77 = vector.load %arg3[%c2_31, %c0_32, %c0_33] : memref<3x8x128xf32, #tpu.memory_space<vmem>>, vector<1x8x128xf32>
    %78 = vector.shape_cast %77 : vector<1x8x128xf32> to vector<8x128xf32>
    %79 = vector.shape_cast %76 : vector<8x128xf32> to vector<1x8x128xf32>
    tpu.vector_store %arg3[%c2_31, %c0_32, %c0_33], %79 {strides = array<i32>} : memref<3x8x128xf32, #tpu.memory_space<vmem>>, vector<1x8x128xf32>,
    return
  }
  func.func @transform_0(%arg0: i32) -> (i32, i32, i32) {
    %c0_i32 = arith.constant 0 : i32
    %c0_i32_0 = arith.constant 0 : i32
    %c0_i32_1 = arith.constant 0 : i32
    return %c0_i32, %arg0, %c0_i32_0 : i32, i32, i32
  }
  func.func @transform_1(%arg0: i32) -> (i32, i32) {
    %c0_i32 = arith.constant 0 : i32
    %c0_i32_0 = arith.constant 0 : i32
    return %arg0, %c0_i32 : i32, i32
  }
  func.func @transform_2(%arg0: i32) -> (i32, i32, i32) {
    %c0_i32 = arith.constant 0 : i32
    %c0_i32_0 = arith.constant 0 : i32
    %c0_i32_1 = arith.constant 0 : i32
    return %c0_i32, %arg0, %c0_i32_0 : i32, i32, i32
  }
}

</mosaic_0001>

<bundles_post_ra>
// kernel: tpu_custom_call.1
= control target key start
LH: loop header
LB: loop body
LE: loop exit
PB: predicated region body
PF: predicated region fallthrough
CT: control target
= control target key end

     0   :  { %8 = vsyncpa [#allocation3], 0  ;;  %s224_s0 = inlined_call_operand.hbm [shape: f32[3,8,128], index: 0, kind: input, shape index: {}]   ;;  %s225_s1 = inlined_call_operand.hbm [shape: f32[8,128], index: 1, kind: output, shape index: {0}]   ;;  %s226_s2 = inlined_call_operand.hbm [shape: f32[3,8,128], index: 2, kind: output, shape index: {1}]  }
   0x1   :  { %9 = vsyncpa [#allocation4], 0 }
   0x2   :  { %10 = vsyncpa [#allocation7], 0  ;;  %s187_s9 = smov [#allocation2]  }
   0x3   :  { %s16_s10 = sshll.u32 %s187_s9, 4  ;;  %s17_s10 = int_to_ptr.vmem [resolvable:$true] %s16_s10 }
   0x4   :  { %s129_s11 = scalar_lea.vmem %s17_s10, 384  ;;  %p134_p1 = scmp.lt.s32.totalorder %s17_s10, %s17_s10 }
   0x5   :  { %p130_p0 = scmp.ne.s32.totalorder %s17_s10, %s129_s11  ;;  %p135_p2 = scmp.lt.s32.totalorder %s129_s11, %s129_s11 }
   0x7   :  { %p136_p3 = por %p135_p2, %p134_p1 }
   0x9   :  { %p137_p4 = pnand %p136_p3, %p130_p0 }
   0xb   :  { %140 = shalt.err (!%p137_p4)
}
   0xc   :  { %s188_s12 = smov 128   ;;  %s189_s13 = smov 8  }
   0xd   :  { %22 = dma.hbm_to_vmem [thread:$0]  %s224_s0, 384, %s17_s10, [#allocation3], %s188_s12, %s188_s12, %s189_s13  }
   0xe   :  { %181 = dma.done.wait [#allocation3], 384  }
   0xf   :  { %182 = vsyncadd [#allocation3], 4294966912  ;;  %v26_v0 = vld [vmem:[#allocation2] sm:$0xff]  ;;  %v28_v1 = vld [vmem:[#allocation2 + $0x8] sm:$0xff]  ;;  %s190_s0 = smov [#allocation5]   ;;  %s191_s17 = smov [#allocation6]  }
  0x10   :  { %v30_v2 = vld [vmem:[#allocation2 + $0x10] sm:$0xff]  ;;  %v31_v3 = vmul.f32 %v26_v0, %v26_v0  ;;  %v32_v4 = vmul.f32 %v28_v1, %v28_v1  ;;  %s86_s16 = sshll.u32 %s190_s0, 4  ;;  %s95_s18 = sshll.u32 %s191_s17, 4  ;;  %s87_s16 = int_to_ptr.vmem [resolvable:$true] %s86_s16  ;;  %s96_s18 = int_to_ptr.vmem [resolvable:$true] %s95_s18 }
  0x11   :  { %v34_v5 = vmul.f32 %v30_v2, %v30_v2  ;;  %s141_s19 = scalar_lea.vmem %s87_s16, 128  ;;  %p146_p6 = scmp.lt.s32.totalorder %s87_s16, %s87_s16 }
  0x12   :  { %v33_v6 = vadd.f32 %v32_v4, %v31_v3  ;;  %p142_p5 = scmp.ne.s32.totalorder %s87_s16, %s141_s19  ;;  %p147_p7 = scmp.lt.s32.totalorder %s141_s19, %s141_s19 }
  0x14   :  { %v35_v7 = vadd.f32 %v34_v5, %v33_v6  ;;  %p148_p8 = por %p147_p7, %p146_p6 }
  0x16   :  { %119 = vrsqrt.f32 %v35_v7  ;;  %p149_p9 = pnand %p148_p8, %p142_p5 }
  0x23   :  { %v120_v8 = vpop.eup %119 }
  0x24   :  { %v37_v9 = vmul.f32 %v120_v8, %v35_v7  ;;  %v55_v10 = vmul.f32 %v120_v8, %v120_v8  ;;  %v70_v35 = vmul.f32 0.1, %v120_v8 }
  0x26   :  { %v111_v11 = vadd.f32 -2.0, %v37_v9  ;;  %v56_v12 = vmul.f32 %v55_v10, %v55_v10  ;;  %vm45_vm0 = vcmp.gt.f32.partialorder %v37_v9, 2.0  ;;  %vm49_vm1 = vcmp.le.f32.partialorder %v37_v9, 2.5 }
  0x27   :  { %vm50_vm2 = vmand %vm45_vm0, %vm49_vm1  ;;  %vm47_vm3 = vcmp.gt.f32.partialorder %v37_v9, 2.5 }
  0x28   :  { %v39_v13 = vmul.f32 2.0, %v111_v11  ;;  %v57_v14 = vmul.f32 %v56_v12, %v55_v10 }
  0x2a   :  { %v40_v15 = vmul.f32 %v39_v13, %v39_v13  ;;  %v41_v16 = vmul.f32 2.0, %v39_v13  ;;  %v51_v17 = vmul.f32 12.0, %v39_v13  ;;  %v113_v18 = vadd.f32 -1.0, %v39_v13 }
  0x2b   :  { %v58_v19 = vmul.f32 %v57_v14, %v57_v14  ;;  %v61_v20 = vmul.f32 6.0, %v57_v14 }
  0x2c   :  { %v112_v21 = vadd.f32 -3.0, %v41_v16  ;;  %v53_v22 = vmul.f32 %v113_v18, %v51_v17 }
  0x2d   :  { %v62_v23 = vmul.f32 12.0, %v58_v19  ;;  %v59_v25 = vsub.f32 %v58_v19, %v57_v14 }
  0x2e   :  { %v43_v24 = vmul.f32 %v112_v21, %v40_v15  ;;  %v54_v26 = vsel %vm50_vm2, %v53_v22, 0.0 }
  0x2f   :  { %v63_v27 = vsub.f32 %v61_v20, %v62_v23  ;;  %v66_v31 = vmul.f32 %v59_v25, %v54_v26 }
  0x30   :  { %v44_v28 = vadd.f32 1.0, %v43_v24 }
  0x31   :  { %v64_v29 = vmul.f32 %v120_v8, %v63_v27 }
  0x32   :  { %v46_v30 = vsel %vm45_vm0, %v44_v28, 1.0 }
  0x33   :  { %v48_v32 = vsel %vm47_vm3, 0.0, %v46_v30 }
  0x34   :  { %v60_v33 = vmul.f32 %v59_v25, %v48_v32  ;;  %v65_v34 = vmul.f32 %v64_v29, %v48_v32 }
  0x36   :  { %v67_v36 = vadd.f32 %v66_v31, %v65_v34  ;;  %v68_v37 = vmul.f32 0.1, %v60_v33 }
  0x38   :  { %69 = vst [vmem:[#allocation5] sm:$0xff] %v68_v37  ;;  %v71_v38 = vmul.f32 %v70_v35, %v67_v36 }
  0x39   :  { %152 = shalt.err (!%p149_p9)
}
  0x3a   :  { %89 = dma.vmem_to_hbm [thread:$0]  %s87_s16, 128, %s225_s1, [#allocation4]   ;;  %v72_v39 = vmul.f32 %v71_v38, %v26_v0  ;;  %v74_v40 = vmul.f32 %v71_v38, %v28_v1  ;;  %v77_v41 = vmul.f32 %v71_v38, %v30_v2 }
  0x3b   :  { %s161_s22 = scalar_lea.vmem %s96_s18, 384  ;;  %p166_p11 = scmp.lt.s32.totalorder %s96_s18, %s96_s18 }
  0x3c   :  { %73 = vst [vmem:[#allocation6] sm:$0xff] %v72_v39  ;;  %76 = vst [vmem:[#allocation6 + $0x8] sm:$0xff] %v74_v40  ;;  %p162_p10 = scmp.ne.s32.totalorder %s96_s18, %s161_s22  ;;  %p167_p12 = scmp.lt.s32.totalorder %s161_s22, %s161_s22 }
  0x3d   :  { %79 = vst [vmem:[#allocation6 + $0x10] sm:$0xff] %v77_v41 }
  0x3e   :  { %p168_p13 = por %p167_p12, %p166_p11 }
  0x40   :  { %p169_p0 = pnand %p168_p13, %p162_p10 }
  0x42   :  { %172 = shalt.err (!%p169_p0)
}
  0x43   :  { %101 = dma.vmem_to_hbm [thread:$0]  %s96_s18, 384, %s226_s2, [#allocation7], %s188_s12, %s188_s12, %s189_s13  }
  0x44   :  { %183 = dma.done.wait [#allocation4], 128  }
  0x45   :  { %184 = vsyncadd [#allocation4], 4294967168 }
  0x46   :  { %185 = dma.done.wait [#allocation7], 384  }
  0x47   :  { %186 = vsyncadd [#allocation7], 4294966912 }
  0x48   :  { %108 = vsyncpa [#allocation3], 1 }
  0x49   :  { %109 = vsyncpa [#allocation4], 1 }
  0x4a   :  { %110 = vsyncpa [#allocation7], 1 }

</bundles_post_ra>
